<compile_context>
chip_gen: v6e
topology: v6e:2x2x1
jax: 0.10.0
libtpu: 0.0.40
codegen_flags: <defaults>
</compile_context>

<pallas_src>
import functools

import jax
import jax.numpy as jnp
from jax import lax
from jax.experimental import pallas as pl
from jax.experimental.pallas import tpu as pltpu


def _round_up(x, m):
    return (x + m - 1) // m * m


def _cdiv(a, b):
    return -(-a // b)


def _tpu_vmem_capacity_bytes():
    """Physical per-core VMEM; conservative 64 MiB (v7x) if unknown."""
    try:
        info = pltpu.get_tpu_info()
        cap = int(getattr(info, "vmem_capacity_bytes", 0))
        if cap > 0:
            return cap
    except Exception:
        pass
    return 64 * 1024 * 1024


# ---------------------------------------------------------------------------
# Kernels
# ---------------------------------------------------------------------------
def _make_single_step_kernel():
    # grid = (batch_blocks,); whole K in one block -> no accumulator scratch,
    # no pl.when branches.
    def kernel(x_ref, w_ref, b_ref, o_ref):
        # x_ref: (tm, K_pad) native dtype; w_ref: (N_pad, K_pad) compute dtype
        xv = x_ref[...].astype(w_ref.dtype)            # VMEM-local cast, no HBM cost
        acc = lax.dot_general(
            xv, w_ref[...],
            dimension_numbers=(((1,), (1,)), ((), ())),
            preferred_element_type=jnp.float32)
        logits = acc + b_ref[...]                      # padded lanes -> -inf
        m = jnp.max(logits, axis=1, keepdims=True)     # real lanes dominate
        e = jnp.exp(logits - m)                        # exp(-inf) == 0 on padding
        o_ref[...] = (e / jnp.sum(e, axis=1, keepdims=True)).astype(o_ref.dtype)

    return kernel


def _make_reduction_kernel(tk, w_resident):
    # grid = (batch_blocks, k_blocks), reduction axis LAST; f32 VMEM accumulator.
    def kernel(x_ref, w_ref, b_ref, o_ref, acc_ref):
        k = pl.program_id(1)

        @pl.when(k == 0)
        def _():
            acc_ref[...] = jnp.zeros_like(acc_ref)

        if w_resident:
            # Whole weight resident in VMEM (constant block index); slice the
            # current K chunk in-register.
            w = w_ref[:, pl.ds(pl.multiple_of(k * tk, 128), tk)]
        else:
            w = w_ref[...]
        xv = x_ref[...].astype(w_ref.dtype)
        acc_ref[...] += lax.dot_general(
            xv, w,
            dimension_numbers=(((1,), (1,)), ((), ())),
            preferred_element_type=jnp.float32)

        @pl.when(k == pl.num_programs(1) - 1)
        def _():
            logits = acc_ref[...] + b_ref[...]
            m = jnp.max(logits, axis=1, keepdims=True)
            e = jnp.exp(logits - m)
            o_ref[...] = (e / jnp.sum(e, axis=1, keepdims=True)).astype(o_ref.dtype)

    return kernel


# ---------------------------------------------------------------------------
# Parameter preparation (call once at init time; hoisted out of forward)
# ---------------------------------------------------------------------------
def prepare_domain_cls_params(weight, bias, *, compute_dtype=jnp.bfloat16,
                              max_tk=2048):
    """weight: (num_domains, in_features) PyTorch nn.Linear layout, bias: (N,)."""
    N, K = weight.shape
    N_pad = _round_up(N, 128)                  # lane-dense output + exact -inf mask

    # K tiling: no padding when K is 128-aligned and fits a single tile;
    # otherwise pad to a multiple of 512 and pick tk in {2048, 1024, 512}.
    if K % 128 == 0 and K <= max_tk:
        K_pad, tk = K, K
    else:
        K_pad = _round_up(K, 512)
        tk = 512
        for cand in (2048, 1024, 512):
            if cand <= max_tk and K_pad % cand == 0:
                tk = cand
                break

    compute_dtype = jnp.dtype(compute_dtype)
    w_itemsize = compute_dtype.itemsize
    # Keep the whole padded weight VMEM-resident when small (small-N classifier):
    # it is DMA'd exactly once instead of once per batch tile.
    w_resident = (N_pad * K_pad * w_itemsize) <= (8 << 20)

    # Zero rows contribute 0 to the dot; -inf bias kills padded-lane softmax mass.
    # NOTE: f32 weights are down-cast to compute_dtype (default bf16); the dot
    # still accumulates in f32 — a small, accepted deviation from PyTorch f32.
    w_p = (jnp.zeros((N_pad, K_pad), dtype=compute_dtype)
           .at[:N, :K].set(weight.astype(compute_dtype)))
    b_p = (jnp.full((1, N_pad), -jnp.inf, dtype=jnp.float32)
           .at[0, :N].set(bias.astype(jnp.float32)))

    return dict(w=w_p, b=b_p, N=N, K=K, N_pad=N_pad, K_pad=K_pad, tk=tk,
                w_resident=w_resident)


def _max_batch_tile(budget_bytes, tk, K_pad, N_pad, x_itemsize, w_itemsize,
                    w_resident, multi_k):
    """Largest tm (multiple of 8, <= 1024) whose live VMEM fits the budget."""
    w_cols = K_pad if w_resident else tk
    fixed = 2 * N_pad * w_cols * w_itemsize + 2 * N_pad * 4        # weight + bias
    per_row = (2 * tk * x_itemsize                                 # x double-buffer
               + 2 * N_pad * 4                                     # out double-buffer
               + (N_pad * 4 if multi_k else 0))                    # acc scratch
    avail = budget_bytes - fixed
    if avail <= 0:
        return 8
    tm = int(avail // per_row) // 8 * 8
    return max(8, min(1024, tm))


# ---------------------------------------------------------------------------
# Forward
# ---------------------------------------------------------------------------
def domain_cls_simple_forward(x, params):
    """x: (B, ...) with prod(...) == in_features (== torch.flatten(x, 1)).
    Returns (B, num_domains) float32 softmax probabilities."""
    B = x.shape[0]
    x_flat = x.reshape(B, -1)                  # torch.flatten(x, 1)
    N, K = params["N"], params["K"]
    N_pad, K_pad, tk = params["N_pad"], params["K_pad"], params["tk"]
    w_p, b_p = params["w"], params["b"]
    w_resident = params["w_resident"]
    if x_flat.shape[1] != K:
        raise ValueError(f"expected {K} flattened features, got {x_flat.shape[1]}")

    x_itemsize = jnp.dtype(x_flat.dtype).itemsize
    w_itemsize = w_p.dtype.itemsize
    multi_k = K_pad > tk

    # VMEM-aware sizing: ~96 MiB scoped limit on 128 MiB chips (v5e/v6e),
    # ~48 MiB on 64 MiB chips (v7x); keep live tile bytes under ~44 MiB.
    vmem_cap = _tpu_vmem_capacity_bytes()
    vmem_limit = min(vmem_cap, max(32 << 20, (vmem_cap * 3) // 4))
    tile_budget = min((vmem_limit * 4) // 5, 44 << 20)

    tm_cap = _max_batch_tile(tile_budget, tk, K_pad, N_pad, x_itemsize,
                             w_itemsize, w_resident, multi_k)
    B8 = _round_up(B, 8)
    if B8 <= 8:
        tm = 8
    else:
        # >= 2 batch blocks so v7x's two TensorCores both get work on the
        # "parallel" axis; one extra grid step is negligible on single-TC chips.
        tm = min(tm_cap, _round_up(_cdiv(B8, 2), 8))
    B_pad = _round_up(B8, tm)

    # Skip the padding copy of x when it is already tile-aligned.
    if B_pad == B and K_pad == K:
        x_in = x_flat
    else:
        x_in = (jnp.zeros((B_pad, K_pad), dtype=x_flat.dtype)
                .at[:B, :K].set(x_flat))

    n_batch_blocks = B_pad // tm
    w_reads = 1 if w_resident else n_batch_blocks
    cost = pl.CostEstimate(
        flops=2 * B * K * N + 5 * B * N,
        transcendentals=B * N,
        bytes_accessed=(B_pad * K_pad * x_itemsize
                        + w_reads * N_pad * K_pad * w_itemsize
                        + B_pad * N_pad * 4 + N_pad * 4),
    )

    if not multi_k:
        grid = (n_batch_blocks,)
        kernel = _make_single_step_kernel()
        in_specs = [
            pl.BlockSpec((tm, K_pad), lambda i: (i, 0)),       # x tile
            pl.BlockSpec((N_pad, K_pad), lambda i: (0, 0)),    # resident weight
            pl.BlockSpec((1, N_pad), lambda i: (0, 0)),        # bias
        ]
        out_spec = pl.BlockSpec((tm, N_pad), lambda i: (i, 0))
        scratch = []
        dims = ("parallel",)
    else:
        grid = (n_batch_blocks, K_pad // tk)
        kernel = _make_reduction_kernel(tk, w_resident)
        if w_resident:
            w_spec = pl.BlockSpec((N_pad, K_pad), lambda i, k: (0, 0))
        else:
            w_spec = pl.BlockSpec((N_pad, tk), lambda i, k: (0, k))
        in_specs = [
            pl.BlockSpec((tm, tk), lambda i, k: (i, k)),       # x tile
            w_spec,                                            # weight
            pl.BlockSpec((1, N_pad), lambda i, k: (0, 0)),     # bias
        ]
        out_spec = pl.BlockSpec((tm, N_pad), lambda i, k: (i, 0))
        scratch = [pltpu.VMEM((tm, N_pad), jnp.float32)]
        dims = ("parallel", "arbitrary")

    out = pl.pallas_call(
        kernel,
        out_shape=jax.ShapeDtypeStruct((B_pad, N_pad), jnp.float32),
        grid_spec=pltpu.PrefetchScalarGridSpec(
            num_scalar_prefetch=0,
            grid=grid,
            in_specs=in_specs,
            out_specs=out_spec,
            scratch_shapes=scratch,
        ),
        compiler_params=pltpu.CompilerParams(
            dimension_semantics=dims,
            vmem_limit_bytes=vmem_limit,
        ),
        cost_estimate=cost,
    )(x_in, w_p, b_p)

    if B_pad == B and N_pad == N:
        return out
    return out[:B, :N]


if __name__ == "__main__":
    # nn.Linear(in_channel=256, num_domains=6); input NCHW with C*H*W == 256.
    in_channel = 256
    num_domains = 6
    batch = 2
    C, H, W = 64, 2, 2            # 64*2*2 == 256 -> exercises flatten(x, 1)

    key = jax.random.PRNGKey(0)
    k_x, k_w, k_b = jax.random.split(key, 3)

    bound = 1.0 / (in_channel ** 0.5)
    weight = jax.random.uniform(k_w, (num_domains, in_channel),
                                minval=-bound, maxval=bound, dtype=jnp.float32)
    bias = jax.random.uniform(k_b, (num_domains,),
                              minval=-bound, maxval=bound, dtype=jnp.float32)
    x = jax.random.normal(k_x, (batch, C, H, W), dtype=jnp.float32)

    # Parameter padding / bf16 cast hoisted out of the per-forward path.
    params = prepare_domain_cls_params(weight, bias, compute_dtype=jnp.bfloat16)
    fwd = jax.jit(functools.partial(domain_cls_simple_forward, params=params))

    out = jax.block_until_ready(fwd(x))

    # Pure-JAX f32 reference; tolerance loosened for bf16 MXU streaming
    # (f32 accumulation keeps the error ~1e-3 on probabilities).
    ref_logits = x.reshape(batch, -1) @ weight.T + bias
    ref = jax.nn.softmax(ref_logits, axis=1)
    assert out.shape == (batch, num_domains)
    assert jnp.allclose(out, ref, atol=5e-3, rtol=5e-3)
    # Exact softmax divide -> rows sum to 1 tightly.
    assert jnp.allclose(jnp.sum(out, axis=1), 1.0, atol=1e-5)

    print("KERNEL_OK")
</pallas_src>

<mosaic_0001>
module attributes {stable_mosaic.version = 11 : i64} {
  func.func @kernel(%arg0: i32, %arg1: memref<8x256xf32, #tpu.memory_space<vmem>>, %arg2: memref<128x256xbf16, #tpu.memory_space<vmem>>, %arg3: memref<1x128xf32, #tpu.memory_space<vmem>>, %arg4: memref<8x128xf32, #tpu.memory_space<vmem>>) attributes {dimension_semantics = [#tpu.dimension_semantics<parallel>], iteration_bounds = array<i64: 1>, scalar_prefetch = 0 : i64, scratch_operands = 0 : i64, tpu.core_type = #tpu.core_type<tc>, window_params = [{transform_indices = @transform_0, window_bounds = array<i64: 8, 256>}, {pipeline_mode = #tpu.pipeline_mode<synchronous>, transform_indices = @transform_1, window_bounds = array<i64: 128, 256>}, {pipeline_mode = #tpu.pipeline_mode<synchronous>, transform_indices = @transform_2, window_bounds = array<i64: 1, 128>}, {transform_indices = @transform_3, window_bounds = array<i64: 8, 128>}]} {
    %c0 = arith.constant 0 : index
    %c0_0 = arith.constant 0 : index
    %0 = vector.load %arg1[%c0, %c0_0] : memref<8x256xf32, #tpu.memory_space<vmem>>, vector<8x256xf32>
    %1 = arith.truncf %0 : vector<8x256xf32> to vector<8x256xbf16>
    %c0_1 = arith.constant 0 : index
    %c0_2 = arith.constant 0 : index
    %2 = vector.load %arg2[%c0_1, %c0_2] : memref<128x256xbf16, #tpu.memory_space<vmem>>, vector<128x256xbf16>
    %cst = arith.constant dense<0.000000e+00> : vector<8x128xf32>
    %3 = tpu.matmul %1, %2, %cst {dimension_numbers = #tpu.dot_dimension_numbers<[1], [1], [0], [0], [0, 0, 1, 0], [], []>} : vector<8x256xbf16>, vector<128x256xbf16>, vector<8x128xf32> -> vector<8x128xf32>
    %c0_3 = arith.constant 0 : index
    %c0_4 = arith.constant 0 : index
    %4 = vector.load %arg3[%c0_3, %c0_4] : memref<1x128xf32, #tpu.memory_space<vmem>>, vector<1x128xf32>
    %5 = vector.broadcast %4 : vector<1x128xf32> to vector<8x128xf32>
    %6 = arith.addf %3, %5 : vector<8x128xf32>
    %cst_5 = arith.constant dense<0xFF800000> : vector<8xf32>
    %7 = vector.multi_reduction <maximumf>, %6, %cst_5 [1] : vector<8x128xf32> to vector<8xf32>
    %8 = vector.shape_cast %7 : vector<8xf32> to vector<8x1xf32>
    %9 = vector.broadcast %8 : vector<8x1xf32> to vector<8x128xf32>
    %10 = arith.subf %6, %9 : vector<8x128xf32>
    %11 = math.exp %10 : vector<8x128xf32>
    %cst_6 = arith.constant dense<0.000000e+00> : vector<8xf32>
    %12 = vector.multi_reduction <add>, %11, %cst_6 [1] : vector<8x128xf32> to vector<8xf32>
    %13 = vector.shape_cast %12 : vector<8xf32> to vector<8x1xf32>
    %14 = vector.broadcast %13 : vector<8x1xf32> to vector<8x128xf32>
    %15 = arith.divf %11, %14 : vector<8x128xf32>
    %c0_7 = arith.constant 0 : index
    %c0_8 = arith.constant 0 : index
    %16 = vector.load %arg4[%c0_7, %c0_8] : memref<8x128xf32, #tpu.memory_space<vmem>>, vector<8x128xf32>
    tpu.vector_store %arg4[%c0_7, %c0_8], %15 {strides = array<i32>} : memref<8x128xf32, #tpu.memory_space<vmem>>, vector<8x128xf32>,
    return
  }
  func.func @transform_0(%arg0: i32) -> (i32, i32) {
    %c0_i32 = arith.constant 0 : i32
    %c0_i32_0 = arith.constant 0 : i32
    return %arg0, %c0_i32 : i32, i32
  }
  func.func @transform_1(%arg0: i32) -> (i32, i32) {
    %c0_i32 = arith.constant 0 : i32
    %c0_i32_0 = arith.constant 0 : i32
    %c0_i32_1 = arith.constant 0 : i32
    return %c0_i32, %c0_i32_0 : i32, i32
  }
  func.func @transform_2(%arg0: i32) -> (i32, i32) {
    %c0_i32 = arith.constant 0 : i32
    %c0_i32_0 = arith.constant 0 : i32
    %c0_i32_1 = arith.constant 0 : i32
    return %c0_i32, %c0_i32_0 : i32, i32
  }
  func.func @transform_3(%arg0: i32) -> (i32, i32) {
    %c0_i32 = arith.constant 0 : i32
    %c0_i32_0 = arith.constant 0 : i32
    return %arg0, %c0_i32 : i32, i32
  }
}

</mosaic_0001>

<bundles_post_ra>
// kernel: domain_cls_simple_forward.1
= control target key start
LH: loop header
LB: loop body
LE: loop exit
PB: predicated region body
PF: predicated region fallthrough
CT: control target
= control target key end

     0   :  { %s301_s1 = inlined_call_operand.vmem [shape: bf16[128,256], index: 1, kind: input, shape index: {}]   ;;  %s302_s0 = inlined_call_operand.vmem [shape: f32[8,256], index: 0, kind: input, shape index: {}]   ;;  %s303_s2 = inlined_call_operand.vmem [shape: f32[1,128], index: 2, kind: input, shape index: {}]   ;;  %s304_s3 = inlined_call_operand.vmem [shape: f32[8,128], index: 3, kind: output, shape index: {}]  }
   0x1   :  { %v193_v0 = vld [vmem:[%s301_s1 + $0x74] ss:$8 sps:$4 sm:$0xff]   ;;  %v195_v1 = vld [vmem:[%s301_s1 + $0x70] ss:$8 sps:$4 sm:$0xff]   ;;  %v196_v2 = vld [vmem:[%s301_s1 + $0x64] ss:$8 sps:$4 sm:$0xff]  }
   0x2   :  { %122 = vmatprep.subr.bf16.mxu0 %v193_v0  ;;  %v198_v3 = vld [vmem:[%s301_s1 + $0x60] ss:$8 sps:$4 sm:$0xff]   ;;  %v199_v4 = vld [vmem:[%s301_s1 + $0x54] ss:$8 sps:$4 sm:$0xff]   ;;  %v201_v7 = vld [vmem:[%s301_s1 + $0x50] ss:$8 sps:$4 sm:$0xff]  }
   0x3   :  { %123 = vmatpush1.bf16.xpose.msra.mxu0 %v195_v1  ;;  %v16_v5 = vld [vmem:[%s302_s0 + $0x8] sm:$0xff]  ;;  %v205_v10 = vld [vmem:[%s301_s1 + $0x34] ss:$8 sps:$4 sm:$0xff]   ;;  %v207_v11 = vld [vmem:[%s301_s1 + $0x30] ss:$8 sps:$4 sm:$0xff]  }
   0x4   :  { %124 = vmatprep.subr.bf16.mxu0 %v196_v2  ;;  %v18_v6 = vpack.c.bf16 %v16_v5, %v16_v5  ;;  %v202_v8 = vld [vmem:[%s301_s1 + $0x44] ss:$8 sps:$4 sm:$0xff]   ;;  %v204_v9 = vld [vmem:[%s301_s1 + $0x40] ss:$8 sps:$4 sm:$0xff]   ;;  %v211_v14 = vld [vmem:[%s301_s1 + $0x14] ss:$8 sps:$4 sm:$0xff]  }
   0x5   :  { %v208_v12 = vld [vmem:[%s301_s1 + $0x24] ss:$8 sps:$4 sm:$0xff]   ;;  %v210_v13 = vld [vmem:[%s301_s1 + $0x20] ss:$8 sps:$4 sm:$0xff]   ;;  %v213_v15 = vld [vmem:[%s301_s1 + $0x10] ss:$8 sps:$4 sm:$0xff]  }
   0x6   :  { %154 = vmatprep.mubr.bf16.mxu0 %v18_v6  ;;  %v214_v16 = vld [vmem:[%s301_s1 + $0x4] ss:$8 sps:$4 sm:$0xff]   ;;  %v216_v17 = vld [vmem:[%s301_s1] ss:$8 sps:$4 sm:$0xff]  }
   0x7   :  { %v15_v18 = vld [vmem:[%s302_s0] sm:$0xff] }
   0x8   :  { %v17_v19 = vpack.c.bf16 %v15_v18, %v15_v18  ;;  %v176_v20 = vld [vmem:[%s303_s2] ss:$0 sm:$0xff] }
   0xb   :  { %125 = vmatpush1.bf16.xpose.msra.mxu0 %v198_v3 }
   0xc   :  { %126 = vmatprep.subr.bf16.mxu0 %v199_v4 }
  0x13   :  { %127 = vmatpush1.bf16.xpose.msra.mxu0 %v201_v7 }
  0x14   :  { %128 = vmatprep.subr.bf16.mxu0 %v202_v8 }
  0x1b   :  { %129 = vmatpush1.bf16.xpose.msra.mxu0 %v204_v9 }
  0x1c   :  { %130 = vmatprep.subr.bf16.mxu0 %v205_v10 }
  0x23   :  { %131 = vmatpush1.bf16.xpose.msra.mxu0 %v207_v11 }
  0x24   :  { %132 = vmatprep.subr.bf16.mxu0 %v208_v12 }
  0x2b   :  { %133 = vmatpush1.bf16.xpose.msra.mxu0 %v210_v13 }
  0x2c   :  { %134 = vmatprep.subr.bf16.mxu0 %v211_v14 }
  0x33   :  { %135 = vmatpush1.bf16.xpose.msra.mxu0 %v213_v15 }
  0x34   :  { %136 = vmatprep.subr.bf16.mxu0 %v214_v16 }
  0x3b   :  { %137 = vmatpush1.bf16.xpose.msra.mxu0 %v216_v17 }
  0x42   :  { %155 = vmatmul.mubr.bf16.vlgmr.msra.gmra.mxu0 %v17_v19 }
 0x102   :  { %v156_v21 = vpop.f32.mrf.mxu0 }
 0x103   :  { %v157_v22 = vadd.f32 %v176_v20, %v156_v21 }
 0x104   :  { %v158_v23 = vpop.f32.mrf.mxu0 }
 0x105   :  { %162 = vmax.xlane.f32.xlu0 %v157_v22 }
 0x106   :  { %v159_v24 = vpop.f32.mrf.mxu0 }
 0x108   :  { %v160_v25 = vpop.f32.mrf.mxu0 }
 0x18e   :  { %v163_v26 = vpop.xlane.xlu0 %162 }
 0x18f   :  { %v164_v27 = vsub.f32 %v157_v22, %v163_v26 }
 0x191   :  { %v165_v28 = vmul.f32 1.442695, %v164_v27 }
 0x193   :  { %217 = vpow2.f32 %v165_v28 }
 0x1a0   :  { %v218_v29 = vpop.eup %217 }
 0x1a1   :  { %167 = vadd.xlane.f32.xlu0 %v218_v29 }
 0x22a   :  { %v168_v30 = vpop.xlane.xlu0 %167 }
 0x22b   :  { %219 = vrcp.f32 %v168_v30 }
 0x238   :  { %v220_v31 = vpop.eup %219 }
 0x239   :  { %v170_v32 = vmul.f32 %v220_v31, %v218_v29 }
 0x23b   :  { %171 = vst [vmem:[%s304_s3] sm:$0xff] %v170_v32 }

</bundles_post_ra>
